<compile_context>
chip_gen: v7x
topology: tpu7x:2x2x1
jax: 0.10.0
libtpu: 0.0.40
codegen_flags: <defaults>
</compile_context>

<pallas_src>
import functools

import numpy as np
import jax
import jax.numpy as jnp
from jax.experimental import pallas as pl
from jax.experimental.pallas import tpu as pltpu

EPS = 1e-5

# (dy, dx) offsets of the 3x3 stencil, in (ky*3 + kx) order.
_OFFSETS = tuple((ddy, ddx) for ddy in (-1, 0, 1) for ddx in (-1, 0, 1))


def _round8(n):
    return (n + 7) // 8 * 8


# ---------------------------------------------------------------------------
# Fused Pallas kernel: whole ResNetUnit for B_TILE images folded onto lanes.
# ---------------------------------------------------------------------------
def resnet_unit_kernel(x_ref, w_ref, shift_ref, mask_ref, out_ref, *,
                       block_meta, W, compute_dtype, stack_conv2):
    P_pad, LANES = out_ref.shape
    masks = mask_ref[...]                       # (8, LANES), 1.0 inside / 0.0 outside

    def mm(a, b):
        return jnp.dot(a.astype(compute_dtype), b.astype(compute_dtype),
                       preferred_element_type=jnp.float32)

    def shift(idx):
        return shift_ref[:, idx:idx + 1]        # (P_pad, 1), broadcast over lanes

    h = x_ref[...]                              # (in_pad0, LANES), lane-dense
    for meta in block_meta:
        in_pad = meta["in_pad"]
        w1 = w_ref[:, meta["w1"]: meta["w1"] + in_pad]
        w3 = w_ref[:, meta["w3"]: meta["w3"] + P_pad]

        # conv1 (1x1, BN scale folded into w1) + shift + ReLU
        h1 = jnp.maximum(mm(w1, h) + shift(meta["b1"]), 0.0)   # (P_pad, LANES) f32

        # conv2 (3x3, stride=1, pad=1): 9 lane-rolled + boundary-masked taps.
        # Masks zero exactly the lanes where the roll would wrap across an image
        # boundary (batch is folded into lanes), so per-image padding is preserved.
        def tap_piece(ddy, ddx, mi):
            off = ddy * W + ddx
            if off == 0:
                return h1
            rolled = pltpu.roll(h1, (-off) % LANES, axis=1)     # XLU lane rotate
            return rolled * masks[mi:mi + 1, :]

        if stack_conv2:
            # Stack the 9 taps along K -> one (P, 9P) @ (9P, LANES) GEMM.
            pieces, mi = [], 0
            for ddy, ddx in _OFFSETS:
                if (ddy, ddx) == (0, 0):
                    pieces.append(h1.astype(compute_dtype))
                else:
                    pieces.append(tap_piece(ddy, ddx, mi).astype(compute_dtype))
                    mi += 1
            stacked = jnp.concatenate(pieces, axis=0)           # (9*P_pad, LANES)
            w2f = w_ref[:, meta["w2"]: meta["w2"] + 9 * P_pad]
            h2 = mm(w2f, stacked)
        else:
            # VMEM-lean path (v7x / large widths): 9 accumulating (P,P) matmuls,
            # never materializing the 9x stacked activation.
            h2 = jnp.zeros((P_pad, LANES), jnp.float32)
            mi = 0
            for tap, (ddy, ddx) in enumerate(_OFFSETS):
                w_tap = w_ref[:, meta["w2"] + tap * P_pad:
                              meta["w2"] + (tap + 1) * P_pad]
                if (ddy, ddx) == (0, 0):
                    piece = h1
                else:
                    piece = tap_piece(ddy, ddx, mi)
                    mi += 1
                h2 = h2 + mm(w_tap, piece)
        h2 = jnp.maximum(h2 + shift(meta["b2"]), 0.0)

        # conv3 (1x1) + shift
        h3 = mm(w3, h2) + shift(meta["b3"])

        # shortcut: 1x1 projection + BN iff in_planes != planes, else identity.
        if meta["has_proj"]:
            ws = w_ref[:, meta["ws"]: meta["ws"] + in_pad]
            sc = mm(ws, h) + shift(meta["bs"])
        else:
            sc = h

        h = jnp.maximum(h3 + sc, 0.0)

    out_ref[...] = h                            # lane-dense (P_pad, LANES) store


# ---------------------------------------------------------------------------
# Host-side prep: BN folding, weight/shift slabs, boundary masks, batch tiling.
# ---------------------------------------------------------------------------
def _fold_scale_shift(bn):
    gamma, beta, mean, var = bn
    scale = gamma / jnp.sqrt(var + EPS)
    shift = beta - mean * scale
    return scale, shift


def _pad2(m, rows, cols):
    return jnp.pad(m, ((0, rows - m.shape[0]), (0, cols - m.shape[1])))


def _pad1(v, n):
    return jnp.pad(v, (0, n - v.shape[0]))


def _build_slabs(params, compute_dtype):
    """Fold BN scale into conv weights, pad channels to multiples of 8, and pack
    every block's weights / shifts into one slab each, with static offsets."""
    P = params[0]["w1"].shape[0]
    P_pad = _round8(P)
    w_cols, shift_cols, metas = [], [], []
    w_off = 0

    def add_w(mat):
        nonlocal w_off
        off = w_off
        w_cols.append(mat)
        w_off += mat.shape[1]
        return off

    def add_shift(vec):
        shift_cols.append(vec)
        return len(shift_cols) - 1

    for p in params:
        in_ch = p["w1"].shape[1]
        in_pad = _round8(in_ch)

        s1, b1 = _fold_scale_shift(p["bn1"])
        w1 = _pad2(p["w1"][:, :, 0, 0] * s1[:, None], P_pad, in_pad)

        s2, b2 = _fold_scale_shift(p["bn2"])
        # (O, I, kH, kW) -> (O, kH, kW, I): K index = (ky*3+kx)*P_pad + i,
        # matching the kernel's tap-stacking / per-tap-slice order.
        w2 = jnp.transpose(p["w2"], (0, 2, 3, 1)) * s2[:, None, None, None]
        w2 = jnp.pad(w2, ((0, P_pad - P), (0, 0), (0, 0), (0, P_pad - P)))
        w2f = w2.reshape(P_pad, 9 * P_pad)

        s3, b3 = _fold_scale_shift(p["bn3"])
        w3 = _pad2(p["w3"][:, :, 0, 0] * s3[:, None], P_pad, P_pad)

        meta = {
            "in_pad": in_pad,
            "has_proj": bool(p["has_proj"]),
            "w1": add_w(w1), "w2": add_w(w2f), "w3": add_w(w3),
            "b1": add_shift(_pad1(b1, P_pad)),
            "b2": add_shift(_pad1(b2, P_pad)),
            "b3": add_shift(_pad1(b3, P_pad)),
        }
        if p["has_proj"]:
            ss, bs = _fold_scale_shift(p["bns"])
            ws = _pad2(p["ws"][:, :, 0, 0] * ss[:, None], P_pad, in_pad)
            meta["ws"] = add_w(ws)
            meta["bs"] = add_shift(_pad1(bs, P_pad))
        metas.append(meta)

    w_slab = jnp.concatenate(w_cols, axis=1).astype(compute_dtype)   # (P_pad, K_tot)
    shift_slab = jnp.stack(shift_cols, axis=1).astype(jnp.float32)   # (P_pad, n_shift)
    return w_slab, shift_slab, tuple(metas), P_pad


def _build_masks(H, W, b_tile):
    """(8, b_tile*HW) float masks for the 8 non-center taps; baked at trace time.
    Lane = b_local*HW + hw, so masks are computed from hw = lane % HW."""
    HW = H * W
    lanes = np.arange(b_tile * HW)
    hw = lanes % HW
    y = hw // W
    x = hw % W
    rows = []
    for ddy, ddx in _OFFSETS:
        if (ddy, ddx) == (0, 0):
            continue
        m = np.ones(lanes.shape, dtype=bool)
        if ddy < 0:
            m &= (y >= -ddy)
        elif ddy > 0:
            m &= (y < H - ddy)
        if ddx < 0:
            m &= (x >= -ddx)
        elif ddx > 0:
            m &= (x < W - ddx)
        rows.append(m.astype(np.float32))
    return jnp.asarray(np.stack(rows, axis=0))


def _choose_b_tile(N, HW, max_lanes):
    """Largest batch tile (divisor of N) that keeps the grid >= 2 wide (v7x has
    2 TCs sharded over parallel grid axes) and keeps lanes per step bounded."""
    best = 1
    for bt in range(1, N + 1):
        if N % bt:
            continue
        if bt * HW > max_lanes:
            continue
        if N // bt >= 2 or (N == 1 and bt == 1):
            best = bt
    return best


def _full_spec(arr):
    r = arr.ndim
    return pl.BlockSpec(arr.shape, lambda g, _r=r: (0,) * _r)


# ---------------------------------------------------------------------------
# Wrapper: ONE pallas_call for the whole multi-block unit.  NCHW in, NCHW out.
# ---------------------------------------------------------------------------
def resnet_unit_forward(x_nchw, params, *, compute_dtype=jnp.float32,
                        max_lanes=8192):
    N, Cin, H, W = x_nchw.shape
    P = params[0]["w1"].shape[0]
    HW = H * W
    Cin_pad = _round8(Cin)

    w_slab, shift_slab, metas, P_pad = _build_slabs(params, compute_dtype)

    b_tile = _choose_b_tile(N, HW, max_lanes)
    G = N // b_tile
    LANES = b_tile * HW

    masks = _build_masks(H, W, b_tile)                      # (8, LANES)

    # NCHW -> (G, Cin_pad, b_tile*HW): batch folded onto lanes (one XLA transpose).
    x_flat = x_nchw.reshape(N, Cin, HW)
    x_flat = jnp.pad(x_flat, ((0, 0), (0, Cin_pad - Cin), (0, 0)))
    x_grp = x_flat.reshape(G, b_tile, Cin_pad, HW)
    x_grp = jnp.transpose(x_grp, (0, 2, 1, 3)).reshape(G, Cin_pad, LANES)

    itemsize = jnp.dtype(compute_dtype).itemsize
    # Use the single stacked-GEMM conv2 only while the 9x activation is small;
    # otherwise accumulate per-tap (keeps the v7x 64 MiB VMEM budget).
    stack_conv2 = 9 * P_pad * LANES * itemsize <= 4 * 2**20

    # Explicit VMEM budget from actual resident footprint (double-buffered I/O,
    # resident slabs, in-flight activations) with headroom, capped for v7x.
    est = (2 * Cin_pad * LANES * 4 + 2 * P_pad * LANES * 4
           + 2 * w_slab.size * itemsize + 2 * shift_slab.size * 4
           + 2 * masks.size * 4
           + (9 * P_pad * LANES * itemsize if stack_conv2 else 0)
           + 6 * P_pad * LANES * 4)
    vmem_limit = int(min(48 * 2**20, max(2 * est, 8 * 2**20)))

    kernel = functools.partial(
        resnet_unit_kernel, block_meta=metas, W=W,
        compute_dtype=compute_dtype, stack_conv2=stack_conv2)

    out = pl.pallas_call(
        kernel,
        out_shape=jax.ShapeDtypeStruct((G, P_pad, LANES), jnp.float32),
        grid=(G,),
        in_specs=[pl.BlockSpec((None, Cin_pad, LANES), lambda g: (g, 0, 0)),
                  _full_spec(w_slab),
                  _full_spec(shift_slab),
                  _full_spec(masks)],
        out_specs=pl.BlockSpec((None, P_pad, LANES), lambda g: (g, 0, 0)),
        compiler_params=pltpu.CompilerParams(
            dimension_semantics=("parallel",),
            vmem_limit_bytes=vmem_limit),
    )(x_grp, w_slab, shift_slab, masks)

    out = out.reshape(G, P_pad, b_tile, HW)
    out = jnp.transpose(out, (0, 2, 1, 3)).reshape(N, P_pad, H, W)
    return out[:, :P]


# ---------------------------------------------------------------------------
# Deterministic parameter setup (PyTorch weight layouts).
# ---------------------------------------------------------------------------
def init_bn(key, c):
    k1, k2, k3, k4 = jax.random.split(key, 4)
    gamma = 1.0 + 0.1 * jax.random.normal(k1, (c,), jnp.float32)
    beta = 0.1 * jax.random.normal(k2, (c,), jnp.float32)
    mean = 0.1 * jax.random.normal(k3, (c,), jnp.float32)
    var = 1.0 + 0.1 * jax.random.uniform(k4, (c,), jnp.float32)
    return gamma, beta, mean, var


def init_bottleneck(key, in_planes, planes):
    ks = jax.random.split(key, 8)
    p = {
        # PyTorch Conv2d weight layout: (out_ch, in_ch, kH, kW)
        "w1": 0.1 * jax.random.normal(ks[0], (planes, in_planes, 1, 1), jnp.float32),
        "bn1": init_bn(ks[1], planes),
        "w2": 0.1 * jax.random.normal(ks[2], (planes, planes, 3, 3), jnp.float32),
        "bn2": init_bn(ks[3], planes),
        "w3": 0.1 * jax.random.normal(ks[4], (planes, planes, 1, 1), jnp.float32),
        "bn3": init_bn(ks[5], planes),
        "has_proj": in_planes != planes,
    }
    if p["has_proj"]:
        p["ws"] = 0.1 * jax.random.normal(ks[6], (planes, in_planes, 1, 1), jnp.float32)
        p["bns"] = init_bn(ks[7], planes)
    return p


# ---------------------------------------------------------------------------
# Pure-JAX reference (same inference-mode BN semantics), NCHW throughout.
# ---------------------------------------------------------------------------
def _bn_apply(x, bn):
    gamma, beta, mean, var = bn
    scale = gamma / jnp.sqrt(var + EPS)
    shift = beta - mean * scale
    return x * scale.reshape(1, -1, 1, 1) + shift.reshape(1, -1, 1, 1)


def ref_bottleneck(x, p):
    dn = ("NCHW", "OIHW", "NCHW")
    h = jax.lax.conv_general_dilated(x, p["w1"], (1, 1), "SAME", dimension_numbers=dn)
    h = jnp.maximum(_bn_apply(h, p["bn1"]), 0.0)
    h = jax.lax.conv_general_dilated(h, p["w2"], (1, 1), "SAME", dimension_numbers=dn)
    h = jnp.maximum(_bn_apply(h, p["bn2"]), 0.0)
    h = jax.lax.conv_general_dilated(h, p["w3"], (1, 1), "SAME", dimension_numbers=dn)
    h = _bn_apply(h, p["bn3"])
    if p["has_proj"]:
        sc = jax.lax.conv_general_dilated(x, p["ws"], (1, 1), "SAME",
                                          dimension_numbers=dn)
        sc = _bn_apply(sc, p["bns"])
    else:
        sc = x
    return jnp.maximum(h + sc, 0.0)


# ---------------------------------------------------------------------------
if __name__ == "__main__":
    # ResNetUnit(amount=2, in_channel=4, out_channel=8) on a (2, 4, 16, 16) input.
    amount, in_channel, out_channel = 2, 4, 8
    N, H, W = 2, 16, 16

    key = jax.random.PRNGKey(0)
    kx, kp = jax.random.split(key)
    x_nchw = jax.random.normal(kx, (N, in_channel, H, W), jnp.float32)

    params = []
    in_planes = in_channel
    for bkey in jax.random.split(kp, amount):
        params.append(init_bottleneck(bkey, in_planes, out_channel))
        in_planes = out_channel  # expansion == 1

    y = resnet_unit_forward(x_nchw, params)

    y_ref = x_nchw
    for p in params:
        y_ref = ref_bottleneck(y_ref, p)

    y = jax.block_until_ready(y)
    assert y.shape == (N, out_channel, H, W)
    err = float(jnp.max(jnp.abs(y - y_ref)))
    assert jnp.allclose(y, y_ref, atol=1e-3, rtol=1e-3), err
    print("KERNEL_OK")
</pallas_src>

<mosaic_0001>
module attributes {stable_mosaic.version = 11 : i64} {
  func.func @resnet_unit_kernel(%arg0: i32, %arg1: memref<1x8x256xf32, #tpu.memory_space<vmem>>, %arg2: memref<8x184xf32, #tpu.memory_space<vmem>>, %arg3: memref<8x7xf32, #tpu.memory_space<vmem>>, %arg4: memref<8x256xf32, #tpu.memory_space<vmem>>, %arg5: memref<1x8x256xf32, #tpu.memory_space<vmem>>) attributes {dimension_semantics = [#tpu.dimension_semantics<parallel>], iteration_bounds = array<i64: 2>, scalar_prefetch = 0 : i64, scratch_operands = 0 : i64, tpu.core_type = #tpu.core_type<tc>, window_params = [{transform_indices = @transform_0, window_bounds = array<i64: 1, 8, 256>}, {pipeline_mode = #tpu.pipeline_mode<synchronous>, transform_indices = @transform_1, window_bounds = array<i64: 8, 184>}, {pipeline_mode = #tpu.pipeline_mode<synchronous>, transform_indices = @transform_2, window_bounds = array<i64: 8, 7>}, {pipeline_mode = #tpu.pipeline_mode<synchronous>, transform_indices = @transform_3, window_bounds = array<i64: 8, 256>}, {transform_indices = @transform_4, window_bounds = array<i64: 1, 8, 256>}]} {
    %c0 = arith.constant 0 : index
    %c0_0 = arith.constant 0 : index
    %0 = vector.load %arg4[%c0, %c0_0] : memref<8x256xf32, #tpu.memory_space<vmem>>, vector<8x256xf32>
    %c0_1 = arith.constant 0 : index
    %c0_2 = arith.constant 0 : index
    %c0_3 = arith.constant 0 : index
    %1 = vector.load %arg1[%c0_1, %c0_2, %c0_3] : memref<1x8x256xf32, #tpu.memory_space<vmem>>, vector<1x8x256xf32>
    %2 = vector.shape_cast %1 : vector<1x8x256xf32> to vector<8x256xf32>
    %c0_4 = arith.constant 0 : index
    %c0_5 = arith.constant 0 : index
    %3 = vector.load %arg2[%c0_4, %c0_5] : memref<8x184xf32, #tpu.memory_space<vmem>>, vector<8x8xf32>
    %c0_6 = arith.constant 0 : index
    %c80 = arith.constant 80 : index
    %4 = vector.load %arg2[%c0_6, %c80] : memref<8x184xf32, #tpu.memory_space<vmem>>, vector<8x8xf32>
    %cst = arith.constant dense<0.000000e+00> : vector<8x256xf32>
    %5 = tpu.matmul %3, %2, %cst {dimension_numbers = #tpu.dot_dimension_numbers<[1], [0], [0], [1], [0, 0, 1, 1], [], []>} : vector<8x8xf32>, vector<8x256xf32>, vector<8x256xf32> -> vector<8x256xf32>
    %c0_7 = arith.constant 0 : index
    %c0_8 = arith.constant 0 : index
    %6 = vector.load %arg3[%c0_7, %c0_8] : memref<8x7xf32, #tpu.memory_space<vmem>>, vector<8x1xf32>
    %7 = vector.broadcast %6 : vector<8x1xf32> to vector<8x256xf32>
    %8 = arith.addf %5, %7 : vector<8x256xf32>
    %cst_9 = arith.constant 0.000000e+00 : f32
    %9 = vector.broadcast %cst_9 : f32 to vector<8x256xf32>
    %10 = arith.maximumf %8, %9 : vector<8x256xf32>
    %c17_i32 = arith.constant 17 : i32
    %11 = tpu.dynamic_rotate %10 by %c17_i32 dim 1 : vector<8x256xf32>, i32 -> vector<8x256xf32>
    %12 = vector.extract_strided_slice %0 {offsets = [0, 0], sizes = [1, 256], strides = [1, 1]} : vector<8x256xf32> to vector<1x256xf32>
    %13 = vector.broadcast %12 : vector<1x256xf32> to vector<8x256xf32>
    %14 = arith.mulf %11, %13 : vector<8x256xf32>
    %c16_i32 = arith.constant 16 : i32
    %15 = tpu.dynamic_rotate %10 by %c16_i32 dim 1 : vector<8x256xf32>, i32 -> vector<8x256xf32>
    %16 = vector.extract_strided_slice %0 {offsets = [1, 0], sizes = [1, 256], strides = [1, 1]} : vector<8x256xf32> to vector<1x256xf32>
    %17 = vector.broadcast %16 : vector<1x256xf32> to vector<8x256xf32>
    %18 = arith.mulf %15, %17 : vector<8x256xf32>
    %c15_i32 = arith.constant 15 : i32
    %19 = tpu.dynamic_rotate %10 by %c15_i32 dim 1 : vector<8x256xf32>, i32 -> vector<8x256xf32>
    %20 = vector.extract_strided_slice %0 {offsets = [2, 0], sizes = [1, 256], strides = [1, 1]} : vector<8x256xf32> to vector<1x256xf32>
    %21 = vector.broadcast %20 : vector<1x256xf32> to vector<8x256xf32>
    %22 = arith.mulf %19, %21 : vector<8x256xf32>
    %c1_i32 = arith.constant 1 : i32
    %23 = tpu.dynamic_rotate %10 by %c1_i32 dim 1 : vector<8x256xf32>, i32 -> vector<8x256xf32>
    %24 = vector.extract_strided_slice %0 {offsets = [3, 0], sizes = [1, 256], strides = [1, 1]} : vector<8x256xf32> to vector<1x256xf32>
    %25 = vector.broadcast %24 : vector<1x256xf32> to vector<8x256xf32>
    %26 = arith.mulf %23, %25 : vector<8x256xf32>
    %c255_i32 = arith.constant 255 : i32
    %27 = tpu.dynamic_rotate %10 by %c255_i32 dim 1 : vector<8x256xf32>, i32 -> vector<8x256xf32>
    %28 = vector.extract_strided_slice %0 {offsets = [4, 0], sizes = [1, 256], strides = [1, 1]} : vector<8x256xf32> to vector<1x256xf32>
    %29 = vector.broadcast %28 : vector<1x256xf32> to vector<8x256xf32>
    %30 = arith.mulf %27, %29 : vector<8x256xf32>
    %c241_i32 = arith.constant 241 : i32
    %31 = tpu.dynamic_rotate %10 by %c241_i32 dim 1 : vector<8x256xf32>, i32 -> vector<8x256xf32>
    %32 = vector.extract_strided_slice %0 {offsets = [5, 0], sizes = [1, 256], strides = [1, 1]} : vector<8x256xf32> to vector<1x256xf32>
    %33 = vector.broadcast %32 : vector<1x256xf32> to vector<8x256xf32>
    %34 = arith.mulf %31, %33 : vector<8x256xf32>
    %c240_i32 = arith.constant 240 : i32
    %35 = tpu.dynamic_rotate %10 by %c240_i32 dim 1 : vector<8x256xf32>, i32 -> vector<8x256xf32>
    %36 = vector.extract_strided_slice %0 {offsets = [6, 0], sizes = [1, 256], strides = [1, 1]} : vector<8x256xf32> to vector<1x256xf32>
    %37 = vector.broadcast %36 : vector<1x256xf32> to vector<8x256xf32>
    %38 = arith.mulf %35, %37 : vector<8x256xf32>
    %c239_i32 = arith.constant 239 : i32
    %39 = tpu.dynamic_rotate %10 by %c239_i32 dim 1 : vector<8x256xf32>, i32 -> vector<8x256xf32>
    %40 = vector.extract_strided_slice %0 {offsets = [7, 0], sizes = [1, 256], strides = [1, 1]} : vector<8x256xf32> to vector<1x256xf32>
    %41 = vector.broadcast %40 : vector<1x256xf32> to vector<8x256xf32>
    %42 = arith.mulf %39, %41 : vector<8x256xf32>
    %43 = tpu.concatenate %14, %18, %22, %26, %10, %30, %34, %38, %42 in 0 : vector<8x256xf32>, vector<8x256xf32>, vector<8x256xf32>, vector<8x256xf32>, vector<8x256xf32>, vector<8x256xf32>, vector<8x256xf32>, vector<8x256xf32>, vector<8x256xf32> -> vector<72x256xf32>
    %c0_10 = arith.constant 0 : index
    %c8 = arith.constant 8 : index
    %44 = vector.load %arg2[%c0_10, %c8] : memref<8x184xf32, #tpu.memory_space<vmem>>, vector<8x72xf32>
    %cst_11 = arith.constant dense<0.000000e+00> : vector<8x256xf32>
    %45 = tpu.matmul %44, %43, %cst_11 {dimension_numbers = #tpu.dot_dimension_numbers<[1], [0], [0], [1], [0, 0, 1, 1], [], []>} : vector<8x72xf32>, vector<72x256xf32>, vector<8x256xf32> -> vector<8x256xf32>
    %c0_12 = arith.constant 0 : index
    %c1 = arith.constant 1 : index
    %46 = vector.load %arg3[%c0_12, %c1] : memref<8x7xf32, #tpu.memory_space<vmem>>, vector<8x1xf32>
    %47 = vector.broadcast %46 : vector<8x1xf32> to vector<8x256xf32>
    %48 = arith.addf %45, %47 : vector<8x256xf32>
    %cst_13 = arith.constant 0.000000e+00 : f32
    %49 = vector.broadcast %cst_13 : f32 to vector<8x256xf32>
    %50 = arith.maximumf %48, %49 : vector<8x256xf32>
    %cst_14 = arith.constant dense<0.000000e+00> : vector<8x256xf32>
    %51 = tpu.matmul %4, %50, %cst_14 {dimension_numbers = #tpu.dot_dimension_numbers<[1], [0], [0], [1], [0, 0, 1, 1], [], []>} : vector<8x8xf32>, vector<8x256xf32>, vector<8x256xf32> -> vector<8x256xf32>
    %c0_15 = arith.constant 0 : index
    %c2 = arith.constant 2 : index
    %52 = vector.load %arg3[%c0_15, %c2] : memref<8x7xf32, #tpu.memory_space<vmem>>, vector<8x1xf32>
    %53 = vector.broadcast %52 : vector<8x1xf32> to vector<8x256xf32>
    %54 = arith.addf %51, %53 : vector<8x256xf32>
    %c0_16 = arith.constant 0 : index
    %c88 = arith.constant 88 : index
    %55 = vector.load %arg2[%c0_16, %c88] : memref<8x184xf32, #tpu.memory_space<vmem>>, vector<8x8xf32>
    %cst_17 = arith.constant dense<0.000000e+00> : vector<8x256xf32>
    %56 = tpu.matmul %55, %2, %cst_17 {dimension_numbers = #tpu.dot_dimension_numbers<[1], [0], [0], [1], [0, 0, 1, 1], [], []>} : vector<8x8xf32>, vector<8x256xf32>, vector<8x256xf32> -> vector<8x256xf32>
    %c0_18 = arith.constant 0 : index
    %c3 = arith.constant 3 : index
    %57 = vector.load %arg3[%c0_18, %c3] : memref<8x7xf32, #tpu.memory_space<vmem>>, vector<8x1xf32>
    %58 = vector.broadcast %57 : vector<8x1xf32> to vector<8x256xf32>
    %59 = arith.addf %56, %58 : vector<8x256xf32>
    %60 = arith.addf %54, %59 : vector<8x256xf32>
    %cst_19 = arith.constant 0.000000e+00 : f32
    %61 = vector.broadcast %cst_19 : f32 to vector<8x256xf32>
    %62 = arith.maximumf %60, %61 : vector<8x256xf32>
    %c0_20 = arith.constant 0 : index
    %c96 = arith.constant 96 : index
    %63 = vector.load %arg2[%c0_20, %c96] : memref<8x184xf32, #tpu.memory_space<vmem>>, vector<8x8xf32>
    %c0_21 = arith.constant 0 : index
    %c176 = arith.constant 176 : index
    %64 = vector.load %arg2[%c0_21, %c176] : memref<8x184xf32, #tpu.memory_space<vmem>>, vector<8x8xf32>
    %cst_22 = arith.constant dense<0.000000e+00> : vector<8x256xf32>
    %65 = tpu.matmul %63, %62, %cst_22 {dimension_numbers = #tpu.dot_dimension_numbers<[1], [0], [0], [1], [0, 0, 1, 1], [], []>} : vector<8x8xf32>, vector<8x256xf32>, vector<8x256xf32> -> vector<8x256xf32>
    %c0_23 = arith.constant 0 : index
    %c4 = arith.constant 4 : index
    %66 = vector.load %arg3[%c0_23, %c4] : memref<8x7xf32, #tpu.memory_space<vmem>>, vector<8x1xf32>
    %67 = vector.broadcast %66 : vector<8x1xf32> to vector<8x256xf32>
    %68 = arith.addf %65, %67 : vector<8x256xf32>
    %cst_24 = arith.constant 0.000000e+00 : f32
    %69 = vector.broadcast %cst_24 : f32 to vector<8x256xf32>
    %70 = arith.maximumf %68, %69 : vector<8x256xf32>
    %c17_i32_25 = arith.constant 17 : i32
    %71 = tpu.dynamic_rotate %70 by %c17_i32_25 dim 1 : vector<8x256xf32>, i32 -> vector<8x256xf32>
    %72 = vector.extract_strided_slice %0 {offsets = [0, 0], sizes = [1, 256], strides = [1, 1]} : vector<8x256xf32> to vector<1x256xf32>
    %73 = vector.broadcast %72 : vector<1x256xf32> to vector<8x256xf32>
    %74 = arith.mulf %71, %73 : vector<8x256xf32>
    %c16_i32_26 = arith.constant 16 : i32
    %75 = tpu.dynamic_rotate %70 by %c16_i32_26 dim 1 : vector<8x256xf32>, i32 -> vector<8x256xf32>
    %76 = vector.extract_strided_slice %0 {offsets = [1, 0], sizes = [1, 256], strides = [1, 1]} : vector<8x256xf32> to vector<1x256xf32>
    %77 = vector.broadcast %76 : vector<1x256xf32> to vector<8x256xf32>
    %78 = arith.mulf %75, %77 : vector<8x256xf32>
    %c15_i32_27 = arith.constant 15 : i32
    %79 = tpu.dynamic_rotate %70 by %c15_i32_27 dim 1 : vector<8x256xf32>, i32 -> vector<8x256xf32>
    %80 = vector.extract_strided_slice %0 {offsets = [2, 0], sizes = [1, 256], strides = [1, 1]} : vector<8x256xf32> to vector<1x256xf32>
    %81 = vector.broadcast %80 : vector<1x256xf32> to vector<8x256xf32>
    %82 = arith.mulf %79, %81 : vector<8x256xf32>
    %c1_i32_28 = arith.constant 1 : i32
    %83 = tpu.dynamic_rotate %70 by %c1_i32_28 dim 1 : vector<8x256xf32>, i32 -> vector<8x256xf32>
    %84 = vector.extract_strided_slice %0 {offsets = [3, 0], sizes = [1, 256], strides = [1, 1]} : vector<8x256xf32> to vector<1x256xf32>
    %85 = vector.broadcast %84 : vector<1x256xf32> to vector<8x256xf32>
    %86 = arith.mulf %83, %85 : vector<8x256xf32>
    %c255_i32_29 = arith.constant 255 : i32
    %87 = tpu.dynamic_rotate %70 by %c255_i32_29 dim 1 : vector<8x256xf32>, i32 -> vector<8x256xf32>
    %88 = vector.extract_strided_slice %0 {offsets = [4, 0], sizes = [1, 256], strides = [1, 1]} : vector<8x256xf32> to vector<1x256xf32>
    %89 = vector.broadcast %88 : vector<1x256xf32> to vector<8x256xf32>
    %90 = arith.mulf %87, %89 : vector<8x256xf32>
    %c241_i32_30 = arith.constant 241 : i32
    %91 = tpu.dynamic_rotate %70 by %c241_i32_30 dim 1 : vector<8x256xf32>, i32 -> vector<8x256xf32>
    %92 = vector.extract_strided_slice %0 {offsets = [5, 0], sizes = [1, 256], strides = [1, 1]} : vector<8x256xf32> to vector<1x256xf32>
    %93 = vector.broadcast %92 : vector<1x256xf32> to vector<8x256xf32>
    %94 = arith.mulf %91, %93 : vector<8x256xf32>
    %c240_i32_31 = arith.constant 240 : i32
    %95 = tpu.dynamic_rotate %70 by %c240_i32_31 dim 1 : vector<8x256xf32>, i32 -> vector<8x256xf32>
    %96 = vector.extract_strided_slice %0 {offsets = [6, 0], sizes = [1, 256], strides = [1, 1]} : vector<8x256xf32> to vector<1x256xf32>
    %97 = vector.broadcast %96 : vector<1x256xf32> to vector<8x256xf32>
    %98 = arith.mulf %95, %97 : vector<8x256xf32>
    %c239_i32_32 = arith.constant 239 : i32
    %99 = tpu.dynamic_rotate %70 by %c239_i32_32 dim 1 : vector<8x256xf32>, i32 -> vector<8x256xf32>
    %100 = vector.extract_strided_slice %0 {offsets = [7, 0], sizes = [1, 256], strides = [1, 1]} : vector<8x256xf32> to vector<1x256xf32>
    %101 = vector.broadcast %100 : vector<1x256xf32> to vector<8x256xf32>
    %102 = arith.mulf %99, %101 : vector<8x256xf32>
    %103 = tpu.concatenate %74, %78, %82, %86, %70, %90, %94, %98, %102 in 0 : vector<8x256xf32>, vector<8x256xf32>, vector<8x256xf32>, vector<8x256xf32>, vector<8x256xf32>, vector<8x256xf32>, vector<8x256xf32>, vector<8x256xf32>, vector<8x256xf32> -> vector<72x256xf32>
    %c0_33 = arith.constant 0 : index
    %c104 = arith.constant 104 : index
    %104 = vector.load %arg2[%c0_33, %c104] : memref<8x184xf32, #tpu.memory_space<vmem>>, vector<8x72xf32>
    %cst_34 = arith.constant dense<0.000000e+00> : vector<8x256xf32>
    %105 = tpu.matmul %104, %103, %cst_34 {dimension_numbers = #tpu.dot_dimension_numbers<[1], [0], [0], [1], [0, 0, 1, 1], [], []>} : vector<8x72xf32>, vector<72x256xf32>, vector<8x256xf32> -> vector<8x256xf32>
    %c0_35 = arith.constant 0 : index
    %c5 = arith.constant 5 : index
    %106 = vector.load %arg3[%c0_35, %c5] : memref<8x7xf32, #tpu.memory_space<vmem>>, vector<8x1xf32>
    %107 = vector.broadcast %106 : vector<8x1xf32> to vector<8x256xf32>
    %108 = arith.addf %105, %107 : vector<8x256xf32>
    %cst_36 = arith.constant 0.000000e+00 : f32
    %109 = vector.broadcast %cst_36 : f32 to vector<8x256xf32>
    %110 = arith.maximumf %108, %109 : vector<8x256xf32>
    %cst_37 = arith.constant dense<0.000000e+00> : vector<8x256xf32>
    %111 = tpu.matmul %64, %110, %cst_37 {dimension_numbers = #tpu.dot_dimension_numbers<[1], [0], [0], [1], [0, 0, 1, 1], [], []>} : vector<8x8xf32>, vector<8x256xf32>, vector<8x256xf32> -> vector<8x256xf32>
    %c0_38 = arith.constant 0 : index
    %c6 = arith.constant 6 : index
    %112 = vector.load %arg3[%c0_38, %c6] : memref<8x7xf32, #tpu.memory_space<vmem>>, vector<8x1xf32>
    %113 = vector.broadcast %112 : vector<8x1xf32> to vector<8x256xf32>
    %114 = arith.addf %111, %113 : vector<8x256xf32>
    %115 = arith.addf %114, %62 : vector<8x256xf32>
    %cst_39 = arith.constant 0.000000e+00 : f32
    %116 = vector.broadcast %cst_39 : f32 to vector<8x256xf32>
    %117 = arith.maximumf %115, %116 : vector<8x256xf32>
    %c0_40 = arith.constant 0 : index
    %c0_41 = arith.constant 0 : index
    %c0_42 = arith.constant 0 : index
    %118 = vector.load %arg5[%c0_40, %c0_41, %c0_42] : memref<1x8x256xf32, #tpu.memory_space<vmem>>, vector<1x8x256xf32>
    %119 = vector.shape_cast %118 : vector<1x8x256xf32> to vector<8x256xf32>
    %120 = vector.shape_cast %117 : vector<8x256xf32> to vector<1x8x256xf32>
    tpu.vector_store %arg5[%c0_40, %c0_41, %c0_42], %120 {strides = array<i32>} : memref<1x8x256xf32, #tpu.memory_space<vmem>>, vector<1x8x256xf32>,
    return
  }
  func.func @transform_0(%arg0: i32) -> (i32, i32, i32) {
    %c0_i32 = arith.constant 0 : i32
    %c0_i32_0 = arith.constant 0 : i32
    %c0_i32_1 = arith.constant 0 : i32
    return %arg0, %c0_i32, %c0_i32_0 : i32, i32, i32
  }
  func.func @transform_1(%arg0: i32) -> (i32, i32) {
    %c0_i32 = arith.constant 0 : i32
    %c0_i32_0 = arith.constant 0 : i32
    %c0_i32_1 = arith.constant 0 : i32
    return %c0_i32, %c0_i32_0 : i32, i32
  }
  func.func @transform_2(%arg0: i32) -> (i32, i32) {
    %c0_i32 = arith.constant 0 : i32
    %c0_i32_0 = arith.constant 0 : i32
    %c0_i32_1 = arith.constant 0 : i32
    return %c0_i32, %c0_i32_0 : i32, i32
  }
  func.func @transform_3(%arg0: i32) -> (i32, i32) {
    %c0_i32 = arith.constant 0 : i32
    %c0_i32_0 = arith.constant 0 : i32
    %c0_i32_1 = arith.constant 0 : i32
    return %c0_i32, %c0_i32_0 : i32, i32
  }
  func.func @transform_4(%arg0: i32) -> (i32, i32, i32) {
    %c0_i32 = arith.constant 0 : i32
    %c0_i32_0 = arith.constant 0 : i32
    %c0_i32_1 = arith.constant 0 : i32
    return %arg0, %c0_i32, %c0_i32_0 : i32, i32, i32
  }
}

</mosaic_0001>

<bundles_post_ra>
// kernel: tpu_custom_call.1
= control target key start
LH: loop header
LB: loop body
LE: loop exit
PB: predicated region body
PF: predicated region fallthrough
CT: control target
= control target key end

     0   :  { %9 = vsyncpa [#allocation3], 0  ;;  %s2123_s0 = inlined_call_operand.hbm [shape: f32[2,8,256], index: 0, kind: input, shape index: {}]   ;;  %s2124_s1 = inlined_call_operand.hbm [shape: f32[8,184], index: 1, kind: input, shape index: {}]   ;;  %s2125_s2 = inlined_call_operand.hbm [shape: f32[8,7], index: 2, kind: input, shape index: {}]   ;;  %s2126_s3 = inlined_call_operand.hbm [shape: f32[8,256], index: 3, kind: input, shape index: {}]   ;;  %s2127_s4 = inlined_call_operand.hbm [shape: f32[2,8,256], index: 4, kind: output, shape index: {}]  }
   0x1   :  { %11 = vsyncpa [#allocation3 + $0x1], 0 }
   0x2   :  { %12 = vsyncpa [#allocation6], 0 }
   0x3   :  { %13 = vsyncpa [#allocation9], 0 }
   0x4   :  { %14 = vsyncpa [#allocation4], 0 }
   0x5   :  { %16 = vsyncpa [#allocation4 + $0x1], 0  ;;  %s1571_s15 = smov 0   ;;  %s1573_s16 = smov 0  }
   0x6   :  { %s1575_s17 = smov 0   ;;  %s1577_s18 = smov 0  }
   0x7 LB: > { %s1592_s19 = sadd.s32 4294967295, %s1517_s18   ;;  %s1155_s20 = sadd.s32 4294967294, %s1517_s18   ;;  %s1517_s18 = sphi %s1577_s18, %s2150_s18   ;;  %s1513_s17 = sphi %s1575_s17, %s2149_s17   ;;  %s1509_s16 = sphi %s1573_s16, %s2148_s16   ;;  %s1505_s15 = sphi %s1571_s15, %s2147_s15  }
   0x8   : > { %p42_p0 = scmp.ne.s32.totalorder %s1509_s16, %s1505_s15  ;;  %p2128_p1 = scmp.eq.s32.totalorder %s1592_s19, 0 }
   0x9   : > { %p135_p3 = scmp.eq.s32.totalorder %s1155_s20, 1  ;;  %p1156_p5 = scmp.ge.s32.totalorder %s1517_s18, 1 }
   0xa   : > { %p1601_p4 = por %p2128_p1, %p42_p0  ;;  %p142_p7 = scmp.lt.s32.totalorder %s1517_s18, 3 }
   0xb   : > { %p1606_p6 = por %p135_p3, %p42_p0  ;;  %s1519_s24 = smov [#allocation5]  }
   0xc   : > { %s2131_s21 = scalar_select %p1601_p4, 1, 0 }
   0xd   : > { %s2132_s22 = scalar_select %p1606_p6, 1, 0 }
   0xe   : > { %p1611_p8 = pnand %p1156_p5, %p142_p7  ;;  %s155_s25 = sshll.u32 %s1519_s24, 4  ;;  %s156_s25 = int_to_ptr.vmem [resolvable:$true] %s155_s25 }
   0xf   : > { %s1520_s26 = smov [#allocation7]   ;;  %s1521_s29 = smov [#allocation8]  }
  0x10   : > { %s2133_s23 = scalar_select %p1611_p8, 1, 0 }
  0x11   : > { %p1238_p10 = pneg %p1611_p8  ;;  %s166_s27 = sshll.u32 %s1520_s26, 4  ;;  %s1624_s27 = int_to_ptr.vmem [resolvable:$true] %s166_s27 }
  0x12   : > { %s177_s30 = sshll.u32 %s1521_s29, 4  ;;  %s1329_s7 = scalar_lea.hbm %s2124_s1, 256  ;;  %s1626_s30 = int_to_ptr.vmem [resolvable:$true] %s177_s30 }
  0x13   : > { %p1620_p11 = pnand %p1238_p10, %p2128_p1  ;;  %p1330_p12 = scmp.ne.s32.totalorder %s2124_s1, %s1329_s7 }
  0x14   : > { %p1336_p5 = scmp.lt.u32.totalorder %s1329_s7, %s2124_s1 }
  0x15   : > { %p1636_p13 = pneg %p1620_p11 }
  0x17   : > { %p1332_p0 = pnand %p1636_p13, %p1330_p12 }
  0x19   : > { %p1333_p3 = pneg %p1332_p0 }
  0x1b   : > { %p1338_p7 = pnand %p1336_p5, %p1333_p3 }
  0x1d   : > { %1341 = shalt.err (!%p1338_p7)
}
  0x1e   : > { %s1342_s13 = scalar_lea.vmem %s156_s25, 256  ;;  %p1350_p2 = scmp.lt.s32.totalorder %s156_s25, %s156_s25 }
  0x1f   : > { %p1343_p10 = scmp.ne.s32.totalorder %s156_s25, %s1342_s13  ;;  %p1351_p6 = scmp.lt.s32.totalorder %s1342_s13, %s1342_s13 }
  0x21   : > { %p1345_p9 = pnand %p1343_p10, %p1636_p13  ;;  %p1352_p4 = por %p1351_p6, %p1350_p2 }
  0x23   : > { %p1346_p1 = pneg %p1345_p9 }
  0x25   : > { %p1353_p8 = pnand %p1352_p4, %p1346_p1 }
  0x27   : > { %1356 = shalt.err (!%p1353_p8)
}
  0x28   : > { %1241 = dma.hbm_to_vmem [thread:$0]  (!%p1620_p11), %s2124_s1, 256, %s156_s25, [#allocation6]  }
  0x29   : > { %s1357_s29 = scalar_lea.hbm %s2125_s2, 128 }
  0x2a   : > { %p1358_p9 = scmp.ne.s32.totalorder %s2125_s2, %s1357_s29  ;;  %p1364_p1 = scmp.lt.u32.totalorder %s1357_s29, %s2125_s2 }
  0x2c   : > { %p1360_p12 = pnand %p1358_p9, %p1636_p13 }
  0x2e   : > { %p1361_p2 = pneg %p1360_p12 }
  0x30   : > { %p1366_p4 = pnand %p1364_p1, %p1361_p2 }
  0x32   : > { %1369 = shalt.err (!%p1366_p4)
}
  0x33   : > { %s1370_s25 = scalar_lea.vmem %s1624_s27, 128  ;;  %p1378_p3 = scmp.lt.s32.totalorder %s1624_s27, %s1624_s27 }
  0x34   : > { %p1371_p6 = scmp.ne.s32.totalorder %s1624_s27, %s1370_s25  ;;  %p1379_p5 = scmp.lt.s32.totalorder %s1370_s25, %s1370_s25 }
  0x36   : > { %p1373_p8 = pnand %p1371_p6, %p1636_p13  ;;  %p1380_p7 = por %p1379_p5, %p1378_p3 }
  0x38   : > { %p1374_p0 = pneg %p1373_p8 }
  0x3a   : > { %p1381_p10 = pnand %p1380_p7, %p1374_p0 }
  0x3c   : > { %1384 = shalt.err (!%p1381_p10)
}
  0x3d   : > { %1244 = dma.hbm_to_vmem [thread:$0]  (!%p1620_p11), %s2125_s2, 128, %s1624_s27, [#allocation6]  }
  0x3e   : > { %s1385_s14 = scalar_lea.hbm %s2126_s3, 256 }
  0x3f   : > { %p1386_p9 = scmp.ne.s32.totalorder %s2126_s3, %s1385_s14  ;;  %p1392_p1 = scmp.lt.u32.totalorder %s1385_s14, %s2126_s3 }
  0x41   : > { %p1388_p12 = pnand %p1386_p9, %p1636_p13 }
  0x43   : > { %p1389_p2 = pneg %p1388_p12 }
  0x45   : > { %p1394_p4 = pnand %p1392_p1, %p1389_p2 }
  0x47   : > { %1397 = shalt.err (!%p1394_p4)
}
  0x48   : > { %s1398_s27 = scalar_lea.vmem %s1626_s30, 256  ;;  %p1406_p3 = scmp.lt.s32.totalorder %s1626_s30, %s1626_s30 }
  0x49   : > { %p1399_p6 = scmp.ne.s32.totalorder %s1626_s30, %s1398_s27  ;;  %p1407_p5 = scmp.lt.s32.totalorder %s1398_s27, %s1398_s27 }
  0x4b   : > { %p1401_p8 = pnand %p1399_p6, %p1636_p13  ;;  %p1408_p7 = por %p1407_p5, %p1406_p3 }
  0x4d   : > { %p1402_p0 = pneg %p1401_p8 }
  0x4f   : > { %p1409_p10 = pnand %p1408_p7, %p1402_p0 }
  0x51   : > { %1412 = shalt.err (!%p1409_p10)
}
  0x52   : > { %1247 = dma.hbm_to_vmem [thread:$0]  (!%p1620_p11), %s2126_s3, 256, %s1626_s30, [#allocation9]  }
  0x53   : > { %s1699_s10 = sadd.s32 1, %s1517_s18   ;;  %s29_s7 = sadd.s32 1, %s1513_s17 }
  0x54   : > { %s26_s28 = ssub.s32 %s1517_s18, %s1699_s10  ;;  %p36_p9 = scmp.ne.s32.totalorder %s1513_s17, %s1509_s16 }
  0x55   : > { %p27_p13 = scmp.eq.s32.totalorder %s26_s28, 0  ;;  %p37_p12 = scmp.eq.s32.totalorder %s1517_s18, 0 }
  0x56   : > { %p1259_p2 = scmp.lt.s32.totalorder %s1517_s18, 2  ;;  %p2136_p4 = scmp.eq.s32.totalorder %s1592_s19, 1 }
  0x57   : > { %s1709_s8 = scalar_select %p27_p13, %s1513_s17, %s29_s7  }
  0x58   : > { %p38_p1 = por %p37_p12, %p36_p9  ;;  %p1713_p6 = por %p2136_p4, %p36_p9 }
  0x59   : > { %s188_s9 = sand.u32 1, %s1513_s17   ;;  %s1182_s11 = sshll.u32 %s1517_s18, 8 }
  0x5a   : > { %s1161_s30 = sshll.u32 %s188_s9, 4  ;;  %s1722_s14 = scalar_lea.hbm %s2123_s0, %s1182_s11 }
  0x5b   : > { %s192_s20 = scalar_lea.vmem [#allocation2], %s1161_s30  ;;  %p1724_p11 = pnand %p1259_p2, %p38_p1 }
  0x5c   : > { %s200_s24 = sshll.u32 %s192_s20, 4  ;;  %s189_s29 = scalar_lea.sflag [#allocation3], %s188_s9  ;;  %s1728_s24 = int_to_ptr.vmem [resolvable:$true] %s200_s24 }
  0x5d   : > { %s1413_s27 = scalar_lea.hbm %s1722_s14, 256  ;;  %p1415_p0 = pneg %p1724_p11 }
  0x5e   : > { %p1414_p8 = scmp.ne.s32.totalorder %s1722_s14, %s1413_s27  ;;  %s1418_s28 = scalar_lea.hbm %s2123_s0, 512 }
  0x5f   : > { %p1419_p7 = scmp.lt.u32.totalorder %s1722_s14, %s2123_s0  ;;  %p1420_p10 = scmp.lt.u32.totalorder %s1418_s28, %s1413_s27 }
  0x60   : > { %p1416_p3 = pnand %p1415_p0, %p1414_p8  ;;  %p1422_p9 = scmp.lt.u32.totalorder %s1413_s27, %s1722_s14 }
  0x61   : > { %p1421_p13 = por %p1420_p10, %p1419_p7 }
  0x62   : > { %p1417_p5 = pneg %p1416_p3 }
  0x63   : > { %p1423_p12 = por %p1422_p9, %p1421_p13 }
  0x65   : > { %p1424_p2 = pnand %p1423_p12, %p1417_p5 }
  0x67   : > { %1427 = shalt.err (!%p1424_p2)
}
  0x68   : > { %s1428_s9 = scalar_lea.vmem %s1728_s24, 256  ;;  %s1522_s30 = smov [#allocation2]  }
  0x69   : > { %p1429_p1 = scmp.ne.s32.totalorder %s1728_s24, %s1428_s9  ;;  %s1433_s12 = sshll.u32 %s1522_s30, 4  ;;  %s1434_s12 = int_to_ptr.vmem [resolvable:$false] %s1433_s12 }
  0x6a   : > { %s1435_s13 = scalar_lea.vmem %s1434_s12, 512  ;;  %p1436_p3 = scmp.lt.s32.totalorder %s1728_s24, %s1434_s12 }
  0x6b   : > { %p1431_p4 = pnand %p1429_p1, %p1415_p0  ;;  %p1437_p7 = scmp.lt.s32.totalorder %s1435_s13, %s1428_s9 }
  0x6d   : > { %p1432_p8 = pneg %p1431_p4  ;;  %p1438_p10 = por %p1437_p7, %p1436_p3 }
  0x6f   : > { %p1439_p13 = pnand %p1438_p10, %p1432_p8 }
  0x71   : > { %1442 = shalt.err (!%p1439_p13)
}
  0x72   : > { %1251 = dma.hbm_to_vmem [thread:$0]  (!%p1724_p11), %s1722_s14, 256, %s1728_s24, %s189_s29  }
  0x73   : > { %p2139_p5 = scmp.ne.s32.totalorder %s2133_s23, 0 }
  0x74   : > { %s1758_s20 = sand.u32 (!%p2139_p5), 1, %s1509_s16   ;;  %p2140_p0 = scmp.ne.s32.totalorder (!%p2139_p5), %s2131_s21, 0 }
  0x75   : > { %209 = sbr.rel (%p2139_p5) target bundleno = 1770 (0x6ea), region = 36  ;;  %s1165_s27 = sshll.u32 (!%p2139_p5), %s1758_s20, 4 }
  0x76   : > { %s212_s5 = scalar_lea.sflag (!%p2139_p5), [#allocation3], %s1758_s20  ;;  %s215_s6 = scalar_lea.vmem (!%p2139_p5), [#allocation2], %s1165_s27 }
  0x7c   : > { %1488 = dma.done.wait (%p2140_p0), %s212_s5, 256  }
  0x7d   : > { %1490 = vsyncadd (%p2140_p0), %s212_s5, 4294967040  ;;  %p2141_p11 = scmp.eq.s32.totalorder %s1592_s19, 0 }
  0x7f   : > { %1492 = dma.done.wait (%p2141_p11), [#allocation6], 384   ;;  %p2142_p9 = pmov %p2141_p11 }
  0x81   : > { %1494 = vsyncadd (%p2142_p9), [#allocation6], 4294966912  ;;  %p2143_p12 = pmov %p2142_p9 }
  0x82   : > { %p2144_p2 = pmov %p2142_p9 }
  0x83   : > { %1496 = dma.done.wait (%p2143_p12), [#allocation9], 256  }
  0x84   : > { %1498 = vsyncadd (%p2144_p2), [#allocation9], 4294967040  ;;  %v1523_v0 = vmov 0.0   ;;  %v1524_v1 = vmov 0   ;;  %v1778_v2 = vld [vmem:[%s215_s6 + $0x8] sm:$0xff]  ;;  %v1780_v3 = vld [vmem:[%s215_s6] sm:$0xff]  ;;  %v344_v14 = vlaneseq }
  0x85   : > { %331 = vmatprep.mubr.f32.mxu1 %v1523_v0  ;;  %1321 = vset.pattern.permute.xlu0 %v1524_v1  ;;  %v1782_v4 = vld [vmem:[#allocation5] sm:$0xff]  ;;  %vm263_vm0 = vcmask 64512   ;;  %v1785_v5 = vld [vmem:[#allocation7] sm:$0xff]  ;;  %s1525_s21 = smov 16   ;;  %s1526_s23 = smov 17   ;;  %v1531_v13 = vmov 1  }
  0x86   : > { %632 = vmatprep.mubr.f32.mxu0 %v1523_v0  ;;  %267 = vmatprep.subr.mxu1 %v1778_v2  ;;  %s1527_s14 = smov 15   ;;  %s1528_s24 = smov 1   ;;  %v1832_v17 = vshrl.u32 %v344_v14, 7  ;;  %v1834_v18 = vand.u32 127, %v344_v14  ;;  %v1837_v22 = vld [vmem:[#allocation8] sm:$0xff]  ;;  %v1839_v23 = vld [vmem:[#allocation8 + $0x8] sm:$0xff] }
  0x87   : > { %268 = vmatpush1.msra.mxu1 %v1780_v3  ;;  %260 = vperm.xlu0 %1321, %v1785_v5   ;;  %s1529_s26 = smov 127   ;;  %s1530_s29 = smov 113   ;;  %vm484_vm9 = vcmask 588800   ;;  %vm879_vm10 = vcmask 195584  }
  0x88   : > { %1170 = vmatmul.mubr.msk.f32.vlgmr.msra.gmra.mrb[0].mxu1 %vm263_vm0, %v1782_v4  ;;  %s1532_s28 = smov 112   ;;  %s1533_s7 = smov 111   ;;  %v368_v20 = vsub.s32 1, %v1832_v17  ;;  %vm363_vm1 = vcmp.lt.s32.totalorder %v1834_v18, 16  ;;  %v351_v24 = vsub.s32 0, %v1832_v17  ;;  %v402_v25 = vsub.s32 3, %v1832_v17 }
  0x89   : > { %551 = vmatprep.mubr.f32.mxu1 %v1523_v0  ;;  %s1534_s11 = smov 120   ;;  %s1535_s9 = smov 48   ;;  %v385_v26 = vsub.s32 2, %v1832_v17  ;;  %v419_v31 = vsub.s32 4, %v1832_v17  ;;  %vm380_vm2 = vcmp.lt.s32.totalorder %v1834_v18, 15  ;;  %vm346_vm3 = vcmp.lt.s32.totalorder %v1834_v18, 17 }
  0x8a   : > { %s1536_s30 = smov 40   ;;  %v1846_v27 = vrot.slane %v1837_v22, %v368_v20  ;;  %v1849_v28 = vrot.slane %v1839_v23, %v368_v20  ;;  %v1859_v34 = vrot.slane %v1837_v22, %v351_v24  ;;  %v1862_v35 = vrot.slane %v1839_v23, %v351_v24  ;;  %s1539_s12 = smov 32  }
  0x8b   : > { %1322 = vset.pattern.permute.xlu0 %v1531_v13  ;;  %vm397_vm4 = vcmp.lt.s32.totalorder %v1834_v18, 1  ;;  %v1866_v36 = vrot.slane %v1839_v23, %v402_v25  ;;  %v1869_v37 = vrot.slane %v1839_v23, %v385_v26  ;;  %v1872_v38 = vrot.slane %v1837_v22, %v402_v25  ;;  %s1542_s13 = smov 24   ;;  %s1543_s5 = smov 80  }
  0x8c   : > { %vm414_vm5 = vcmp.lt.s32.totalorder %v1834_v18, 127  ;;  %v1878_v43 = vrot.slane %v1839_v23, %v419_v31  ;;  %v1894_v52 = vrot.slane %v1837_v22, %v385_v26  ;;  %v436_v53 = vsub.s32 5, %v1832_v17  ;;  %s1183_s6 = sshll.u32 %s1592_s19, 8  ;;  %s1042_s19 = scalar_lea.sflag [#allocation4], %s1758_s20 }
  0x8d   : > { %v1904_v62 = vrot.slane %v1837_v22, %v419_v31  ;;  %vm431_vm6 = vcmp.lt.s32.totalorder %v1834_v18, 113  ;;  %vm448_vm7 = vcmp.lt.s32.totalorder %v1834_v18, 112  ;;  %vm465_vm8 = vcmp.lt.s32.totalorder %v1834_v18, 111 }
  0x8e   : > { %v1913_v13 = vrot.slane %v1837_v22, %v436_v53 }
 0x106   : > { %v261_v6 = vpop.permute.xlu0 %260 }
 0x15b   : > { %v333_v7 = vpop.f32.mrb[0].mxu1 }
 0x15c   : > { %v334_v8 = vadd.f32 %v333_v7, %v261_v6  ;;  %v335_v9 = vpop.f32.mrb[1].mxu1  ;;  %v453_v7 = vsub.s32 6, %v1832_v17 }
 0x15d   : > { %v336_v11 = vadd.f32 %v335_v9, %v261_v6 }
 0x15e   : > { %v1792_v10 = vmax.f32 %v334_v8, 0.0  ;;  %v1922_v20 = vrot.slane %v1837_v22, %v453_v7 }
 0x15f   : > { %v1798_v12 = vmax.f32 %v336_v11, 0.0 }
 0x160   : > { %359 = vrot.lane.b32.xlu1 %v1792_v10, %s1525_s21  ;;  %340 = vrot.lane.b32.xlu0 %v1792_v10, %s1526_s23 }
 0x164   : > { %376 = vrot.lane.b32.xlu1 %v1792_v10, %s1527_s14  ;;  %361 = vrot.lane.b32.xlu0 %v1798_v12, %s1525_s21 }
 0x168   : > { %393 = vrot.lane.b32.xlu1 %v1792_v10, %s1528_s24  ;;  %378 = vrot.lane.b32.xlu0 %v1798_v12, %s1527_s14 }
 0x16c   : > { %342 = vrot.lane.b32.xlu1 %v1798_v12, %s1526_s23  ;;  %395 = vrot.lane.b32.xlu0 %v1798_v12, %s1528_s24 }
 0x170   : > { %410 = vrot.lane.b32.xlu1 %v1792_v10, %s1529_s26  ;;  %412 = vrot.lane.b32.xlu0 %v1798_v12, %s1529_s26 }
 0x174   : > { %427 = vrot.lane.b32.xlu1 %v1792_v10, %s1530_s29  ;;  %429 = vrot.lane.b32.xlu0 %v1798_v12, %s1530_s29 }
 0x178   : > { %444 = vrot.lane.b32.xlu1 %v1792_v10, %s1532_s28  ;;  %446 = vrot.lane.b32.xlu0 %v1798_v12, %s1532_s28 }
 0x17c   : > { %461 = vrot.lane.b32.xlu1 %v1792_v10, %s1533_s7  ;;  %463 = vrot.lane.b32.xlu0 %v1798_v12, %s1533_s7 }
 0x180   : > { %482 = vrot.lane.b32.xlu1 %v1782_v4, %s1534_s11  ;;  %479 = vperm.xlu0 %1322, %v1785_v5  }
 0x184   : > { %564 = vrot.lane.b32.xlu1 %v1782_v4, %s1535_s9 }
 0x188   : > { %643 = vrot.lane.b32.xlu1 %v1782_v4, %s1536_s30 }
 0x1d2   : > { %v360_v15 = vpop.permute.xlu1 %359  ;;  %v341_v16 = vpop.permute.xlu0 %340 }
 0x1d6   : > { %v377_v19 = vpop.permute.xlu1 %376  ;;  %v362_v21 = vpop.permute.xlu0 %361 }
 0x1d7   : > { %v364_v32 = vsel %vm363_vm1, %v360_v15, %v362_v21  ;;  %v365_v33 = vsel %vm363_vm1, %v362_v21, %v360_v15  ;;  %v1925_v21 = vrot.slane %v1839_v23, %v453_v7 }
 0x1d8   : > { %v374_v39 = vmul.f32 %v1846_v27, %v365_v33  ;;  %v375_v40 = vmul.f32 %v1849_v28, %v364_v32 }
 0x1da   : > { %v394_v29 = vpop.permute.xlu1 %393  ;;  %v379_v30 = vpop.permute.xlu0 %378 }
 0x1db   : > { %v381_v44 = vsel %vm380_vm2, %v377_v19, %v379_v30  ;;  %v382_v54 = vsel %vm380_vm2, %v379_v30, %v377_v19  ;;  %v470_v19 = vsub.s32 7, %v1832_v17 }
 0x1dc   : > { %v392_v55 = vmul.f32 %v1869_v37, %v381_v44  ;;  %v391_v8 = vmul.f32 %v1894_v52, %v382_v54 }
 0x1dd   : > { %v1939_v32 = vrot.slane %v1839_v23, %v470_v19 }
 0x1de   : > { %v343_v41 = vpop.permute.xlu1 %342  ;;  %v396_v42 = vpop.permute.xlu0 %395 }
 0x1df   : > { %v347_v45 = vsel %vm346_vm3, %v341_v16, %v343_v41  ;;  %v348_v46 = vsel %vm346_vm3, %v343_v41, %v341_v16  ;;  %v398_v47 = vsel %vm397_vm4, %v394_v29, %v396_v42  ;;  %v399_v50 = vsel %vm397_vm4, %v396_v42, %v394_v29 }
 0x1e0   : > { %v357_v48 = vmul.f32 %v1859_v34, %v348_v46  ;;  %v358_v49 = vmul.f32 %v1862_v35, %v347_v45  ;;  %v409_v51 = vmul.f32 %v1866_v36, %v398_v47  ;;  %v408_v60 = vmul.f32 %v1872_v38, %v399_v50 }
 0x1e1   : > { %v1917_v16 = vrot.slane %v1839_v23, %v436_v53  ;;  %v1948_v47 = vrot.slane %v1837_v22, %v470_v19  ;;  %v1538_v22 = vmov 2  }
 0x1e2   : > { %v1186_v56 = vpack.c.bf16 %v374_v39, %v357_v48  ;;  %v411_v57 = vpop.permute.xlu1 %410  ;;  %v413_v58 = vpop.permute.xlu0 %412  ;;  %v1184_v59 = vpack.c.bf16 %v375_v40, %v358_v49  ;;  %v1188_v6 = vpack.c.bf16 %v409_v51, %v392_v55  ;;  %v1190_v14 = vpack.c.bf16 %v408_v60, %v391_v8  ;;  %1323 = vset.pattern.permute.xlu0 %v1538_v22 }
 0x1e3   : > { %v416_v61 = vsel %vm414_vm5, %v413_v58, %v411_v57  ;;  %v415_v63 = vsel %vm414_vm5, %v411_v57, %v413_v58  ;;  %v1537_v51 = vmov 3   ;;  %561 = vperm.xlu0 %1323, %v1785_v5  }
 0x1e4   : > { %v426_v1 = vmul.f32 %v1878_v43, %v416_v61  ;;  %1185 = vmatprep.subr.bf16.mxu1 %v1184_v59  ;;  %v425_v15 = vmul.f32 %v1904_v62, %v415_v63  ;;  %1324 = vset.pattern.permute.xlu1 %v1537_v51  ;;  %v1540_v63 = vmov 4  }
 0x1e5   : > { %1187 = vmatpush1.bf16.msra.mxu1 %v1186_v56  ;;  %640 = vperm.xlu1 %1324, %v1785_v5  }
 0x1e6   : > { %v428_v9 = vpop.permute.xlu1 %427  ;;  %v430_v11 = vpop.permute.xlu0 %429  ;;  %1189 = vmatprep.subr.bf16.mxu1 %v1188_v6  ;;  %v1192_v24 = vpack.c.bf16 %v426_v1, %v1798_v12  ;;  %v1194_v17 = vpack.c.bf16 %v425_v15, %v1792_v10 }
 0x1e7   : > { %v432_v25 = vsel %vm431_vm6, %v428_v9, %v430_v11  ;;  %v433_v26 = vsel %vm431_vm6, %v430_v11, %v428_v9  ;;  %1325 = vset.pattern.permute.xlu0 %v1540_v63 }
 0x1e8   : > { %v442_v33 = vmul.f32 %v1913_v13, %v432_v25  ;;  %v443_v39 = vmul.f32 %v1917_v16, %v433_v26  ;;  %724 = vperm.xlu0 %1325, %v1785_v5  }
 0x1e9   : > { %1191 = vmatpush1.bf16.msra.mxu1 %v1190_v14  ;;  %727 = vrot.lane.b32.xlu1 %v1782_v4, %s1539_s12 }
 0x1ea   : > { %v445_v29 = vpop.permute.xlu1 %444  ;;  %v447_v30 = vpop.permute.xlu0 %446  ;;  %1193 = vmatprep.subr.bf16.mxu1 %v1192_v24 }
 0x1eb   : > { %v449_v31 = vsel %vm448_vm7, %v445_v29, %v447_v30  ;;  %v450_v12 = vsel %vm448_vm7, %v447_v30, %v445_v29 }
 0x1ec   : > { %v459_v40 = vmul.f32 %v1922_v20, %v449_v31  ;;  %v460_v41 = vmul.f32 %v1925_v21, %v450_v12  ;;  %v722_v31 = vld [vmem:[#allocation5 + $0x8] sm:$0xff] }
 0x1ed   : > { %1195 = vmatpush1.bf16.msra.mxu1 %v1194_v17 }
 0x1ee   : > { %v1198_v42 = vpack.c.bf16 %v459_v40, %v442_v33  ;;  %v462_v10 = vpop.permute.xlu1 %461  ;;  %v464_v44 = vpop.permute.xlu0 %463  ;;  %v1196_v45 = vpack.c.bf16 %v460_v41, %v443_v39 }
 0x1ef   : > { %v467_v46 = vsel %vm465_vm8, %v464_v44, %v462_v10  ;;  %v466_v23 = vsel %vm465_vm8, %v462_v10, %v464_v44 }
 0x1f0   : > { %v477_v48 = vmul.f32 %v1939_v32, %v467_v46  ;;  %1197 = vmatprep.subr.bf16.mxu1 %v1196_v45  ;;  %v476_v49 = vmul.f32 %v1948_v47, %v466_v23 }
 0x1f1   : > { %1199 = vmatpush1.bf16.msra.mxu1 %v1198_v42 }
 0x1f2   : > { %503 = vmatprep.subr.mxu1 %v477_v48  ;;  %v483_v50 = vpop.permute.xlu1 %482 }
 0x1f5   : > { %504 = vmatpush1.msra.mxu1 %v476_v49 }
 0x1f6   : > { %1171 = vmatmul.mubr.msk.f32.vlgmr.msra.gmra.mrb[2].mxu1 %vm484_vm9, %v483_v50  ;;  %v565_v60 = vpop.permute.xlu1 %564 }
 0x1f7   : > { %1028 = vmatprep.mubr.f32.mxu1 %v1523_v0 }
 0x1fa   : > { %v644_v61 = vpop.permute.xlu1 %643 }
 0x1ff   : > { %v480_v53 = vpop.permute.xlu0 %479 }
 0x262   : > { %v562_v6 = vpop.permute.xlu0 %561 }
 0x264   : > { %v641_v1 = vpop.permute.xlu1 %640 }
 0x265   : > { %v1216_v7 = vadd.f32 %v641_v1, %v562_v6 }
 0x267   : > { %v725_v19 = vpop.permute.xlu0 %724 }
 0x268   : > { %v728_v15 = vpop.permute.xlu1 %727 }
 0x2c9   : > { %v553_v54 = vpop.f32.mrb[2].mxu1 }
 0x2ca   : > { %v554_v55 = vadd.f32 %v553_v54, %v480_v53  ;;  %v555_v56 = vpop.f32.mrb[3].mxu1 }
 0x2cb   : > { %v556_v57 = vadd.f32 %v555_v56, %v480_v53 }
 0x2cc   : > { %v558_v59 = vmax.f32 %v554_v55, 0.0 }
 0x2cd   : > { %v559_v58 = vmax.f32 %v556_v57, 0.0 }
 0x2cf   : > { %568 = vmatprep.subr.mxu0 %v559_v58 }
 0x2d0   : > { %569 = vmatpush1.msra.mxu0 %v558_v59 }
 0x2d1   : > { %1172 = vmatmul.mubr.msk.f32.vlgmr.msra.gmra.mrb[0].mxu0 %vm263_vm0, %v565_v60  ;;  %647 = vmatprep.subr.mxu0 %v1778_v2 }
 0x2d2   : > { %648 = vmatpush1.msra.mxu0 %v1780_v3  ;;  %711 = vmatprep.mubr.f32.mxu0 %v1523_v0 }
 0x2d9   : > { %1173 = vmatmul.mubr.msk.f32.vlgmr.msra.gmra.mrb[0].mxu0 %vm263_vm0, %v644_v61 }
 0x2da   : > { %795 = vmatprep.mubr.f32.mxu0 %v1523_v0 }
 0x3ac   : > { %v713_v8 = vpop.f32.mrb[0].mxu0 }
 0x3ad   : > { %v1966_v9 = vadd.f32 %v1216_v7, %v713_v8  ;;  %v715_v2 = vpop.f32.mrb[1].mxu0 }
 0x3ae   : > { %v1968_v11 = vadd.f32 %v1216_v7, %v715_v2 }
 0x3af   : > { %v720_v14 = vmax.f32 %v1966_v9, 0.0 }
 0x3b0   : > { %v721_v3 = vmax.f32 %v1968_v11, 0.0 }
 0x3b2   : > { %731 = vmatprep.subr.mxu0 %v721_v3 }
 0x3b3   : > { %732 = vmatpush1.msra.mxu0 %v720_v14 }
 0x3b4   : > { %1174 = vmatmul.mubr.msk.f32.vlgmr.msra.gmra.mrb[2].mxu0 %vm263_vm0, %v728_v15 }
 0x3b5   : > { %947 = vmatprep.mubr.f32.mxu0 %v1523_v0  ;;  %v1541_v0 = vmov 5  }
 0x3b6   : > { %1326 = vset.pattern.permute.xlu0 %v1541_v0 }
 0x487   : > { %v797_v24 = vpop.f32.mrb[2].mxu0 }
 0x488   : > { %v798_v25 = vadd.f32 %v797_v24, %v725_v19  ;;  %v799_v26 = vpop.f32.mrb[3].mxu0 }
 0x489   : > { %v800_v30 = vadd.f32 %v799_v26, %v725_v19 }
 0x48a   : > { %v1978_v29 = vmax.f32 %v798_v25, 0.0 }
 0x48b   : > { %v1984_v17 = vmax.f32 %v800_v30, 0.0 }
 0x48c   : > { %812 = vrot.lane.b32.xlu0 %v1978_v29, %s1525_s21  ;;  %804 = vrot.lane.b32.xlu1 %v1978_v29, %s1526_s23 }
 0x490   : > { %820 = vrot.lane.b32.xlu0 %v1978_v29, %s1527_s14  ;;  %806 = vrot.lane.b32.xlu1 %v1984_v17, %s1526_s23 }
 0x494   : > { %828 = vrot.lane.b32.xlu0 %v1978_v29, %s1528_s24  ;;  %814 = vrot.lane.b32.xlu1 %v1984_v17, %s1525_s21  ;;  %s251_s21 = scalar_lea.vmem [#allocation10], %s1165_s27 }
 0x495   : > { %s1056_s23 = sshll.u32 %s251_s21, 4  ;;  %s2081_s23 = int_to_ptr.vmem [resolvable:$true] %s1056_s23 }
 0x496   : > { %s1443_s27 = scalar_lea.vmem %s2081_s23, 256 }
 0x497   : > { %p1444_p1 = scmp.ne.s32.totalorder %s2081_s23, %s1443_s27 }
 0x498   : > { %836 = vrot.lane.b32.xlu0 %v1978_v29, %s1529_s26  ;;  %822 = vrot.lane.b32.xlu1 %v1984_v17, %s1527_s14 }
 0x499   : > { %p1445_p4 = pnand %p1444_p1, %p1713_p6 }
 0x49b   : > { %p1446_p8 = pneg %p1445_p4 }
 0x49c   : > { %844 = vrot.lane.b32.xlu0 %v1978_v29, %s1530_s29  ;;  %830 = vrot.lane.b32.xlu1 %v1984_v17, %s1528_s24 }
 0x4a0   : > { %852 = vrot.lane.b32.xlu0 %v1978_v29, %s1532_s28  ;;  %838 = vrot.lane.b32.xlu1 %v1984_v17, %s1529_s26  ;;  %s2079_s26 = scalar_lea.hbm %s2127_s4, %s1183_s6 }
 0x4a4   : > { %860 = vrot.lane.b32.xlu0 %v1978_v29, %s1533_s7  ;;  %846 = vrot.lane.b32.xlu1 %v1984_v17, %s1530_s29  ;;  %s1545_s29 = smov [#allocation10]  }
 0x4a8   : > { %854 = vrot.lane.b32.xlu1 %v1984_v17, %s1532_s28  ;;  %875 = vrot.lane.b32.xlu0 %v1782_v4, %s1542_s13  ;;  %s1447_s28 = sshll.u32 %s1545_s29, 4  ;;  %s1448_s28 = int_to_ptr.vmem [resolvable:$false] %s1447_s28 }
 0x4a9   : > { %p1450_p3 = scmp.lt.s32.totalorder %s2081_s23, %s1448_s28 }
 0x4ac   : > { %862 = vrot.lane.b32.xlu1 %v1984_v17, %s1533_s7  ;;  %870 = vperm.xlu0 %1326, %v1785_v5   ;;  %s1449_s7 = scalar_lea.vmem %s1448_s28, 512 }
 0x4ad   : > { %p1451_p7 = scmp.lt.s32.totalorder %s1449_s7, %s1443_s27 }
 0x4af   : > { %p1452_p10 = por %p1451_p7, %p1450_p3 }
 0x4b0   : > { %877 = vrot.lane.b32.xlu1 %v722_v31, %s1542_s13 }
 0x4b1   : > { %p1453_p13 = pnand %p1452_p10, %p1446_p8 }
 0x4b4   : > { %960 = vrot.lane.b32.xlu1 %v722_v31, %s1543_s5 }
 0x4fe   : > { %v813_v12 = vpop.permute.xlu0 %812  ;;  %v805_v33 = vpop.permute.xlu1 %804 }
 0x502   : > { %v821_v39 = vpop.permute.xlu0 %820  ;;  %v807_v40 = vpop.permute.xlu1 %806 }
 0x503   : > { %v808_v41 = vsel %vm346_vm3, %v805_v33, %v807_v40  ;;  %v809_v42 = vsel %vm346_vm3, %v807_v40, %v805_v33 }
 0x504   : > { %v810_v46 = vmul.f32 %v809_v42, %v1859_v34  ;;  %v811_v23 = vmul.f32 %v808_v41, %v1862_v35 }
 0x506   : > { %v829_v4 = vpop.permute.xlu0 %828  ;;  %v815_v10 = vpop.permute.xlu1 %814 }
 0x507   : > { %v816_v44 = vsel %vm363_vm1, %v813_v12, %v815_v10  ;;  %v817_v45 = vsel %vm363_vm1, %v815_v10, %v813_v12 }
 0x508   : > { %v818_v48 = vmul.f32 %v817_v45, %v1846_v27  ;;  %v819_v49 = vmul.f32 %v816_v44, %v1849_v28 }
 0x50a   : > { %v1202_v50 = vpack.c.bf16 %v818_v48, %v810_v46  ;;  %v837_v51 = vpop.permute.xlu0 %836  ;;  %v823_v22 = vpop.permute.xlu1 %822  ;;  %v1200_v53 = vpack.c.bf16 %v819_v49, %v811_v23 }
 0x50b   : > { %v824_v54 = vsel %vm380_vm2, %v821_v39, %v823_v22  ;;  %v825_v55 = vsel %vm380_vm2, %v823_v22, %v821_v39 }
 0x50c   : > { %1201 = vmatprep.subr.bf16.mxu0 %v1200_v53  ;;  %v826_v28 = vmul.f32 %v825_v55, %v1894_v52  ;;  %v827_v35 = vmul.f32 %v824_v54, %v1869_v37 }
 0x50d   : > { %1203 = vmatpush1.bf16.msra.mxu0 %v1202_v50 }
 0x50e   : > { %v831_v56 = vpop.permute.xlu1 %830  ;;  %v845_v57 = vpop.permute.xlu0 %844 }
 0x50f   : > { %v832_v34 = vsel %vm397_vm4, %v829_v4, %v831_v56  ;;  %v833_v27 = vsel %vm397_vm4, %v831_v56, %v829_v4 }
 0x510   : > { %v834_v58 = vmul.f32 %v833_v27, %v1872_v38  ;;  %v835_v59 = vmul.f32 %v832_v34, %v1866_v36 }
 0x512   : > { %v1206_v60 = vpack.c.bf16 %v834_v58, %v826_v28  ;;  %v839_v61 = vpop.permute.xlu1 %838  ;;  %v1204_v63 = vpack.c.bf16 %v835_v59, %v827_v35  ;;  %v853_v37 = vpop.permute.xlu0 %852 }
 0x513   : > { %v840_v1 = vsel %vm414_vm5, %v837_v51, %v839_v61  ;;  %v841_v6 = vsel %vm414_vm5, %v839_v61, %v837_v51 }
 0x514   : > { %v842_v7 = vmul.f32 %v840_v1, %v1904_v62  ;;  %v843_v52 = vmul.f32 %v841_v6, %v1878_v43  ;;  %1205 = vmatprep.subr.bf16.mxu0 %v1204_v63 }
 0x515   : > { %1207 = vmatpush1.bf16.msra.mxu0 %v1206_v60 }
 0x516   : > { %v1210_v38 = vpack.c.bf16 %v842_v7, %v1978_v29  ;;  %v847_v8 = vpop.permute.xlu1 %846  ;;  %v1208_v36 = vpack.c.bf16 %v843_v52, %v1984_v17  ;;  %v861_v24 = vpop.permute.xlu0 %860 }
 0x517   : > { %v848_v2 = vsel %vm431_vm6, %v845_v57, %v847_v8  ;;  %v849_v15 = vsel %vm431_vm6, %v847_v8, %v845_v57 }
 0x518   : > { %1209 = vmatprep.subr.bf16.mxu0 %v1208_v36  ;;  %v850_v25 = vmul.f32 %v848_v2, %v1913_v13  ;;  %v851_v26 = vmul.f32 %v849_v15, %v1917_v16 }
 0x519   : > { %1211 = vmatpush1.bf16.msra.mxu0 %v1210_v38 }
 0x51a   : > { %v855_v19 = vpop.permute.xlu1 %854  ;;  %v876_v40 = vpop.permute.xlu0 %875 }
 0x51b   : > { %v856_v43 = vsel %vm448_vm7, %v853_v37, %v855_v19  ;;  %v857_v62 = vsel %vm448_vm7, %v855_v19, %v853_v37 }
 0x51c   : > { %v858_v29 = vmul.f32 %v856_v43, %v1922_v20  ;;  %v859_v30 = vmul.f32 %v857_v62, %v1925_v21  ;;  %v1544_v21 = vmov 6  }
 0x51d   : > { %1327 = vset.pattern.permute.xlu1 %v1544_v21  ;;  %1328 = vset.pattern.permute.xlu0 %v1544_v21 }
 0x51e   : > { %v1214_v17 = vpack.c.bf16 %v858_v29, %v850_v25  ;;  %v863_v0 = vpop.permute.xlu1 %862  ;;  %v1212_v31 = vpack.c.bf16 %v859_v30, %v851_v26  ;;  %957 = vperm.xlu1 %1327, %v1785_v5  }
 0x51f   : > { %v865_v12 = vsel %vm465_vm8, %v863_v0, %v861_v24  ;;  %v864_v33 = vsel %vm465_vm8, %v861_v24, %v863_v0 }
 0x520   : > { %v867_v39 = vmul.f32 %v865_v12, %v1939_v32  ;;  %1213 = vmatprep.subr.bf16.mxu0 %v1212_v31  ;;  %v866_v16 = vmul.f32 %v864_v33, %v1948_v47 }
 0x521   : > { %1215 = vmatpush1.bf16.msra.mxu0 %v1214_v17 }
 0x522   : > { %899 = vmatprep.subr.mxu0 %v867_v39  ;;  %v878_v13 = vpop.permute.xlu1 %877 }
 0x523   : > { %v880_v20 = vsel %vm879_vm10, %v876_v40, %v878_v13 }
 0x525   : > { %900 = vmatpush1.msra.mxu0 %v866_v16 }
 0x526   : > { %1175 = vmatmul.mubr.msk.f32.vlgmr.msra.gmra.mrb[4].mxu0 %vm484_vm9, %v880_v20  ;;  %v961_v45 = vpop.permute.xlu1 %960 }
 0x52b   : > { %v871_v18 = vpop.permute.xlu0 %870 }
 0x59d   : > { %v958_v47 = vpop.permute.xlu1 %957 }
 0x5f9   : > { %v949_v41 = vpop.f32.mrb[4].mxu0 }
 0x5fa   : > { %v950_v32 = vadd.f32 %v949_v41, %v871_v18  ;;  %v951_v42 = vpop.f32.mrb[5].mxu0 }
 0x5fb   : > { %v952_v4 = vadd.f32 %v951_v42, %v871_v18 }
 0x5fc   : > { %v954_v44 = vmax.f32 %v950_v32, 0.0 }
 0x5fd   : > { %v955_v10 = vmax.f32 %v952_v4, 0.0 }
 0x5ff   : > { %964 = vmatprep.subr.mxu1 %v955_v10 }
 0x600   : > { %965 = vmatpush1.msra.mxu1 %v954_v44 }
 0x601   : > { %1176 = vmatmul.mubr.msk.f32.vlgmr.msra.gmra.mrb[4].mxu1 %vm263_vm0, %v961_v45 }
 0x6d4   : > { %v1030_v46 = vpop.f32.mrb[4].mxu1 }
 0x6d5   : > { %v1031_v23 = vadd.f32 %v1030_v46, %v958_v47  ;;  %v1032_v48 = vpop.f32.mrb[5].mxu1 }
 0x6d6   : > { %v1033_v5 = vadd.f32 %v1032_v48, %v958_v47 }
 0x6d7   : > { %v1035_v49 = vadd.f32 %v1031_v23, %v720_v14 }
 0x6d8   : > { %v1036_v50 = vadd.f32 %v1033_v5, %v721_v3 }
 0x6d9   : > { %v1037_v51 = vmax.f32 %v1035_v49, 0.0 }
 0x6da   : > { %v1038_v22 = vmax.f32 %v1036_v50, 0.0 }
 0x6db   : > { %1039 = vst [vmem:[%s251_s21] sm:$0xff] %v1037_v51 }
 0x6dc   : > { %1040 = vst [vmem:[%s251_s21 + $0x8] sm:$0xff] %v1038_v22 }
 0x6dd   : > { %1456 = shalt.err (!%p1453_p13)
}
 0x6de   : > { %s1457_s20 = scalar_lea.hbm %s2079_s26, 256  ;;  %s1461_s30 = scalar_lea.hbm %s2127_s4, 512 }
 0x6df   : > { %p1458_p5 = scmp.ne.s32.totalorder %s2079_s26, %s1457_s20  ;;  %p1462_p9 = scmp.lt.u32.totalorder %s2079_s26, %s2127_s4 }
 0x6e0   : > { %p1463_p12 = scmp.lt.u32.totalorder %s1461_s30, %s1457_s20  ;;  %p1465_p1 = scmp.lt.u32.totalorder %s1457_s20, %s2079_s26 }
 0x6e1   : > { %p1459_p0 = pnand %p1458_p5, %p1713_p6 }
 0x6e2   : > { %p1464_p2 = por %p1463_p12, %p1462_p9 }
 0x6e3   : > { %p1460_p11 = pneg %p1459_p0 }
 0x6e4   : > { %p1466_p4 = por %p1465_p1, %p1464_p2 }
 0x6e6   : > { %p1467_p8 = pnand %p1466_p4, %p1460_p11 }
 0x6e8   : > { %1470 = shalt.err (!%p1467_p8)
}
 0x6e9   : > { %1236 = dma.vmem_to_hbm [thread:$0]  (%p1713_p6), %s2081_s23, 256, %s2079_s26, %s1042_s19  }
 0x6ea PF: > { %s1068_s5 = sand.u32 1, %s1505_s15   ;;  %p2145_p3 = scmp.ne.s32.totalorder %s2132_s22, 0 }
 0x6eb   : > { %p2146_p7 = scmp.ge.s32.totalorder %s1517_s18, 2  ;;  %s1069_s6 = scalar_lea.sflag [#allocation4], %s1068_s5 }
 0x6ed   : > { %p1253_p10 = pnand %p2146_p7, %p2145_p3 }
 0x6ef   : > { %1500 = dma.done.wait (!%p1253_p10), %s1069_s6, 256  }
 0x6f0   : > { %1502 = vsyncadd (!%p1253_p10), %s1069_s6, 4294967040  ;;  %p19_p13 = scmp.ge.s32.totalorder %s1699_s10, 4   ;;  %s2147_s15 = smov %s1509_s16 }
 0x6f1   : > { %s2148_s16 = smov %s1513_s17  ;;  %s2149_s17 = smov %s1709_s8 }
 0x6f2   : > { %s2150_s18 = smov %s1699_s10  ;;  %21 = sbr.rel (!%p19_p13) target bundleno = 7 (0x7), region = 93 }
 0x6f9   :  { %1074 = vsyncpa [#allocation3], 1 }
 0x6fa   :  { %1076 = vsyncpa [#allocation3 + $0x1], 1 }
 0x6fb   :  { %1077 = vsyncpa [#allocation6], 1 }
 0x6fc   :  { %1078 = vsyncpa [#allocation9], 1 }
 0x6fd   :  { %1079 = vsyncpa [#allocation4], 1 }
 0x6fe   :  { %1081 = vsyncpa [#allocation4 + $0x1], 1 }

</bundles_post_ra>
